<compile_context>
chip_gen: v5e
topology: v5e:2x2
jax: 0.10.0
libtpu: 0.0.40
codegen_flags: <defaults>
</compile_context>

<pallas_src>
import math

import jax
import jax.numpy as jnp
from jax.experimental import pallas as pl
from jax.experimental.pallas import tpu as pltpu


_DC_CAP = 8192   # feature-tile width in lanes (multiple of 128)
_TB_CAP = 2048   # batch-tile cap in rows


def _physical_vmem_bytes() -> int:
    try:
        return int(pltpu.get_tpu_info().vmem_capacity_bytes)
    except Exception:
        return 64 * 1024 * 1024  # conservative default: v7x per-TensorCore VMEM


def _pick_tiles(batch: int, feat: int, itemsize: int, phys_vmem: int):
    """Pick (tb, dc, n_bt, n_dt) bounded by a per-chip VMEM budget."""
    # Feature tile: full D if small (block == full dim), else a 128-multiple.
    dc = feat if feat <= _DC_CAP else _DC_CAP

    # Budget ~1/3 of physical VMEM for the double-buffered native-dtype inputs
    # plus the ~3 tile-sized f32 temporaries (two casts + diff) per iteration.
    budget = phys_vmem // 3
    per_row = dc * (4 * itemsize + 3 * 4)
    max_rows = max(8, (budget // per_row) // 8 * 8)

    if batch <= 8:
        tb = batch                          # block equals full batch dim
    else:
        tb = min(_TB_CAP, (batch // 8) * 8, max_rows)
        if batch >= 16:                     # >=2 batch tiles so v7x megacore gets work
            tb = min(tb, max(8, (batch // 2) // 8 * 8))
        tb = max(8, tb)

    n_bt = -(-batch // tb)
    n_dt = -(-feat // dc)
    return tb, dc, n_bt, n_dt


def _make_metric_kernel(transform, feat: int, dc: int, inv_d: float):
    """Per-tile kernel.

    orig_ref, gen_ref : [tb, dc] native dtype in VMEM
    out_ref           : [tb, 128] float32 (per-sample metric broadcast on lanes)
    acc_ref           : [tb, 1]  float32 scratch accumulator (lives across k)
    """
    needs_mask = (feat % dc) != 0

    def kernel(orig_ref, gen_ref, out_ref, acc_ref):
        k = pl.program_id(1)

        @pl.when(k == 0)
        def _init():
            acc_ref[...] = jnp.zeros_like(acc_ref)

        # Cast to f32 inside the kernel (ship native dtype over HBM).
        o = orig_ref[...].astype(jnp.float32)
        g = gen_ref[...].astype(jnp.float32)
        # transform = nn.Identity() by default; shape-preserving elementwise
        # transforms are fused here instead of separate XLA ops.
        if transform is not None:
            o = transform(o)
            g = transform(g)

        # TODO(synk): `Metric.forward` is abstract in the PyTorch source; a
        # concrete subclass defines the exact reduction.  Per-sample MSE is
        # used as the representative concrete metric.
        diff = g - o
        sq = diff * diff
        if needs_mask:
            # Ragged last feature tile: zero out-of-range columns.
            valid = feat - k * dc
            col = jax.lax.broadcasted_iota(jnp.int32, sq.shape, 1)
            sq = jnp.where(col < valid, sq, 0.0)

        acc_ref[...] += jnp.sum(sq, axis=1, keepdims=True)

        @pl.when(k == pl.num_programs(1) - 1)
        def _finalize():
            # Broadcast across all 128 lanes -> unmasked full-width stores,
            # written once per batch tile.
            out_ref[...] = jnp.broadcast_to(acc_ref[...] * inv_d, out_ref.shape)

    return kernel


def _metric_pallas(orig_flat, gen_flat, transform):
    B, D = gen_flat.shape
    itemsize = jnp.dtype(gen_flat.dtype).itemsize
    phys_vmem = _physical_vmem_bytes()
    tb, dc, n_bt, n_dt = _pick_tiles(B, D, itemsize, phys_vmem)

    # If the batch tile is not a multiple of 8 (only when B < 8), the block
    # must equal the full first dim of BOTH inputs -> trim `original` to B
    # rows (at most 7 rows copied; zero cost in the common case).
    if tb % 8 != 0 and orig_flat.shape[0] != B:
        orig_flat = orig_flat[:B]

    # VMEM: 2 inputs x 2 pipeline buffers + ~3 f32 temporaries + output + acc.
    in_tile = tb * dc * itemsize
    working = 4 * in_tile + 3 * tb * dc * 4 + 2 * tb * 128 * 4 + tb * 4
    vmem_limit = int(min(max(working + (2 << 20), 16 << 20),
                         phys_vmem * 7 // 8))

    kernel = _make_metric_kernel(transform, D, dc, 1.0 / float(D))

    out = pl.pallas_call(
        kernel,
        out_shape=jax.ShapeDtypeStruct((n_bt * tb, 128), jnp.float32),
        grid=(n_bt, n_dt),
        in_specs=[
            pl.BlockSpec((tb, dc), lambda i, k: (i, k)),
            pl.BlockSpec((tb, dc), lambda i, k: (i, k)),
        ],
        out_specs=pl.BlockSpec((tb, 128), lambda i, k: (i, 0)),
        scratch_shapes=[pltpu.VMEM((tb, 1), jnp.float32)],
        compiler_params=pltpu.CompilerParams(
            dimension_semantics=("parallel", "arbitrary"),
            vmem_limit_bytes=vmem_limit,
        ),
        cost_estimate=pl.CostEstimate(
            flops=3 * B * D,
            transcendentals=0,
            bytes_accessed=2 * B * D * itemsize + n_bt * tb * 128 * 4,
        ),
    )(orig_flat, gen_flat)

    return out[:B, :1]  # [B, 1]


class PallasMetric:
    """JAX/Pallas analogue of the PyTorch `Metric` module."""

    def __init__(self, original: jnp.ndarray, metric_config=None, transform=None):
        self.original = original
        self.config = metric_config
        # transform defaults to identity (nn.Identity() in the PyTorch source);
        # shape-preserving elementwise transforms are fused in-kernel.
        # TODO(synk): non-shape-preserving transforms would need plain JAX glue
        # before the kernel and are not covered here.
        self.transform = transform
        b0 = original.shape[0]
        self._orig_flat = original.reshape(b0, -1)
        self._d = int(self._orig_flat.shape[1])
        # jit caches per (shape, dtype): no retrace / host re-dispatch of the
        # reshape + pallas_call + slice on repeated forward() calls.
        self._forward_jit = jax.jit(self._forward_impl)

    def _forward_impl(self, generated, orig_flat):
        b = generated.shape[0]
        gen_flat = generated.reshape(b, -1)
        # `original` is passed un-sliced; the grid only covers its first
        # ceil(B/tb) tiles, so no HBM copy of the reference tensor is made.
        return _metric_pallas(orig_flat, gen_flat, self.transform)

    def forward(self, generated: jnp.ndarray) -> jnp.ndarray:
        b = generated.shape[0]
        if b > self._orig_flat.shape[0]:
            raise ValueError(
                f"generated batch ({b}) exceeds original batch "
                f"({self._orig_flat.shape[0]}); use sample_indices() to pair.")
        if math.prod(generated.shape[1:]) != self._d:
            raise ValueError("generated feature shape does not match original")
        return self._forward_jit(generated, self._orig_flat)  # [B, 1]

    def __call__(self, generated):
        return self.forward(generated)

    def sample_indices(self, batch_size: int, key=None):
        # torch: np.random.choice(original.shape[0], batch_size, replace=True)
        if key is None:
            key = jax.random.PRNGKey(0)
        return jax.random.randint(
            key, (batch_size,), 0, self.original.shape[0], dtype=jnp.int32)


if __name__ == "__main__":
    key = jax.random.PRNGKey(0)
    k1, k2, k3, k4 = jax.random.split(key, 4)

    # --- demo shape: B=2, C=4, H=16, W=16 (D = 1024) ---
    B, C, H, W = 2, 4, 16, 16
    original = jax.random.normal(k1, (B, C, H, W), dtype=jnp.float32)
    generated = jax.random.normal(k2, (B, C, H, W), dtype=jnp.float32)

    metric = PallasMetric(original)
    out = jax.block_until_ready(metric(generated))

    ref = jnp.mean(
        (generated.reshape(B, -1) - original.reshape(B, -1)) ** 2,
        axis=1, keepdims=True)
    assert out.shape == (B, 1)
    assert jnp.allclose(out, ref, atol=1e-5, rtol=1e-5)

    # --- ragged batch: B=10 -> two 8-row tiles, last one partial (no pad) ---
    B2, C2, H2, W2 = 10, 3, 8, 8
    original2 = jax.random.normal(k3, (B2, C2, H2, W2), dtype=jnp.float32)
    generated2 = jax.random.normal(k4, (B2, C2, H2, W2), dtype=jnp.float32)

    metric2 = PallasMetric(original2)
    out2 = jax.block_until_ready(metric2(generated2))

    ref2 = jnp.mean(
        (generated2.reshape(B2, -1) - original2.reshape(B2, -1)) ** 2,
        axis=1, keepdims=True)
    assert out2.shape == (B2, 1)
    assert jnp.allclose(out2, ref2, atol=1e-5, rtol=1e-5)

    print("KERNEL_OK")
</pallas_src>

<mosaic_0001>
module attributes {stable_mosaic.version = 11 : i64} {
  func.func @kernel(%arg0: i32, %arg1: i32, %arg2: memref<2x1024xf32, #tpu.memory_space<vmem>>, %arg3: memref<2x1024xf32, #tpu.memory_space<vmem>>, %arg4: memref<2x128xf32, #tpu.memory_space<vmem>>, %arg5: memref<2x1xf32, #tpu.memory_space<vmem>>) attributes {dimension_semantics = [#tpu.dimension_semantics<parallel>, #tpu.dimension_semantics<arbitrary>], iteration_bounds = array<i64: 1, 1>, scalar_prefetch = 0 : i64, scratch_operands = 1 : i64, tpu.core_type = #tpu.core_type<tc>, window_params = [{transform_indices = @transform_0, window_bounds = array<i64: 2, 1024>}, {transform_indices = @transform_1, window_bounds = array<i64: 2, 1024>}, {transform_indices = @transform_2, window_bounds = array<i64: 2, 128>}]} {
    %c0_i32 = arith.constant 0 : i32
    %0 = arith.cmpi eq, %arg1, %c0_i32 : i32
    %1 = arith.extui %0 : i1 to i32
    %c0_i32_0 = arith.constant 0 : i32
    %2 = arith.cmpi ne, %1, %c0_i32_0 : i32
    scf.if %2 {
      %cst_10 = arith.constant 0.000000e+00 : f32
      %15 = vector.broadcast %cst_10 : f32 to vector<2x1xf32>
      %c0_11 = arith.constant 0 : index
      %c0_12 = arith.constant 0 : index
      %16 = vector.load %arg5[%c0_11, %c0_12] : memref<2x1xf32, #tpu.memory_space<vmem>>, vector<2x1xf32>
      tpu.vector_store %arg5[%c0_11, %c0_12], %15 {strides = array<i32>} : memref<2x1xf32, #tpu.memory_space<vmem>>, vector<2x1xf32>,
    } else {
    }
    %c0 = arith.constant 0 : index
    %c0_1 = arith.constant 0 : index
    %3 = vector.load %arg2[%c0, %c0_1] : memref<2x1024xf32, #tpu.memory_space<vmem>>, vector<2x1024xf32>
    %c0_2 = arith.constant 0 : index
    %c0_3 = arith.constant 0 : index
    %4 = vector.load %arg3[%c0_2, %c0_3] : memref<2x1024xf32, #tpu.memory_space<vmem>>, vector<2x1024xf32>
    %5 = arith.subf %4, %3 : vector<2x1024xf32>
    %6 = arith.mulf %5, %5 : vector<2x1024xf32>
    %c0_4 = arith.constant 0 : index
    %c0_5 = arith.constant 0 : index
    %7 = vector.load %arg5[%c0_4, %c0_5] : memref<2x1xf32, #tpu.memory_space<vmem>>, vector<2x1xf32>
    %cst = arith.constant dense<0.000000e+00> : vector<2xf32>
    %8 = vector.multi_reduction <add>, %6, %cst [1] : vector<2x1024xf32> to vector<2xf32>
    %9 = vector.shape_cast %8 : vector<2xf32> to vector<2x1xf32>
    %10 = arith.addf %7, %9 : vector<2x1xf32>
    %c0_6 = arith.constant 0 : index
    %c0_7 = arith.constant 0 : index
    %11 = vector.load %arg5[%c0_6, %c0_7] : memref<2x1xf32, #tpu.memory_space<vmem>>, vector<2x1xf32>
    tpu.vector_store %arg5[%c0_6, %c0_7], %10 {strides = array<i32>} : memref<2x1xf32, #tpu.memory_space<vmem>>, vector<2x1xf32>,
    %c0_i32_8 = arith.constant 0 : i32
    %12 = arith.cmpi eq, %arg1, %c0_i32_8 : i32
    %13 = arith.extui %12 : i1 to i32
    %c0_i32_9 = arith.constant 0 : i32
    %14 = arith.cmpi ne, %13, %c0_i32_9 : i32
    scf.if %14 {
      %c0_10 = arith.constant 0 : index
      %c0_11 = arith.constant 0 : index
      %15 = vector.load %arg5[%c0_10, %c0_11] : memref<2x1xf32, #tpu.memory_space<vmem>>, vector<2x1xf32>
      %cst_12 = arith.constant 9.765625E-4 : f32
      %16 = vector.broadcast %cst_12 : f32 to vector<2x1xf32>
      %17 = arith.mulf %15, %16 : vector<2x1xf32>
      %18 = vector.shape_cast %17 : vector<2x1xf32> to vector<2x1xf32>
      %19 = vector.broadcast %18 : vector<2x1xf32> to vector<2x128xf32>
      %c0_13 = arith.constant 0 : index
      %c0_14 = arith.constant 0 : index
      %20 = vector.load %arg4[%c0_13, %c0_14] : memref<2x128xf32, #tpu.memory_space<vmem>>, vector<2x128xf32>
      tpu.vector_store %arg4[%c0_13, %c0_14], %19 {strides = array<i32>} : memref<2x128xf32, #tpu.memory_space<vmem>>, vector<2x128xf32>,
    } else {
    }
    return
  }
  func.func @transform_0(%arg0: i32, %arg1: i32) -> (i32, i32) {
    %c0_i32 = arith.constant 0 : i32
    return %arg0, %arg1 : i32, i32
  }
  func.func @transform_1(%arg0: i32, %arg1: i32) -> (i32, i32) {
    %c0_i32 = arith.constant 0 : i32
    return %arg0, %arg1 : i32, i32
  }
  func.func @transform_2(%arg0: i32, %arg1: i32) -> (i32, i32) {
    %c0_i32 = arith.constant 0 : i32
    %c0_i32_0 = arith.constant 0 : i32
    return %arg0, %c0_i32 : i32, i32
  }
}

</mosaic_0001>

<bundles_post_ra>
// kernel: _forward_impl.1
= control target key start
LH: loop header
LB: loop body
LE: loop exit
PB: predicated region body
PF: predicated region fallthrough
CT: control target
= control target key end

     0   :  { %vm15_vm0 = vcmask 1024   ;;  %v86_v3 = vmov 0.0   ;;  %vm47_vm1 = vcmask 1041408   ;;  %v87_v32 = vmov 0   ;;  %s128_s0 = inlined_call_operand.vmem [shape: f32[2,1024], index: 0, kind: input, shape index: {}]   ;;  %s129_s1 = inlined_call_operand.vmem [shape: f32[2,1024], index: 1, kind: input, shape index: {}]   ;;  %s130_s2 = inlined_call_operand.vmem [shape: f32[2,128], index: 2, kind: output, shape index: {}]  }
   0x1   :  { %v17_v0 = vld [vmem:[%s128_s0] sm:$0xff]  ;;  %v18_v1 = vld [vmem:[%s128_s0 + $0x8] sm:$0xff]  ;;  %16 = vst.msk [vmem:[#allocation2] sm:$0x3] %vm15_vm0, %v86_v3  ;;  %85 = vset.pattern.permute.xlu0 %v87_v32 }
   0x2   :  { %v19_v2 = vld [vmem:[%s129_s1] sm:$0xff]  ;;  %v20_v4 = vld [vmem:[%s129_s1 + $0x8] sm:$0xff] }
   0x3   :  { %v21_v5 = vsub.f32 %v19_v2, %v17_v0  ;;  %v22_v6 = vsub.f32 %v20_v4, %v18_v1 }
   0x5   :  { %v23_v7 = vmul.f32 %v21_v5, %v21_v5  ;;  %v24_v8 = vmul.f32 %v22_v6, %v22_v6 }
   0x7   :  { %28 = vst [vmem:[#allocation1] ss:$4 sm:$0xff] %v23_v7 }
   0x8   :  { %30 = vst [vmem:[#allocation1 + $0x20] ss:$4 sm:$0xff] %v24_v8  ;;  %v25_v33 = vld [vmem:[#allocation2] sm:$0x3] }
   0xe   :  { %v31_v9 = vld.sshfl [vmem:[#allocation1] sm:$0xff pattern:$0x73625140]  ;;  %v32_v10 = vld.sshfl [vmem:[#allocation1 + $0x8] sm:$0xff pattern:$0x73625140] }
   0xf   :  { %v33_v11 = vld.sshfl [vmem:[#allocation1 + $0x10] sm:$0xff pattern:$0x73625140]  ;;  %v34_v12 = vld.sshfl [vmem:[#allocation1 + $0x18] sm:$0xff pattern:$0x73625140] }
  0x10   :  { %v48_v13 = vsel %vm47_vm1, %v31_v9, 0.0  ;;  %v49_v14 = vsel %vm47_vm1, %v32_v10, 0.0  ;;  %v51_v15 = vsel %vm47_vm1, %v33_v11, 0.0  ;;  %v35_v16 = vld.sshfl [vmem:[#allocation1 + $0x20] sm:$0xff pattern:$0x73625140] }
  0x11   :  { %v50_v17 = vadd.f32 %v49_v14, %v48_v13  ;;  %v53_v18 = vsel %vm47_vm1, %v34_v12, 0.0  ;;  %v36_v19 = vld.sshfl [vmem:[#allocation1 + $0x28] sm:$0xff pattern:$0x73625140]  ;;  %v55_v21 = vsel %vm47_vm1, %v35_v16, 0.0 }
  0x12   :  { %v37_v22 = vld.sshfl [vmem:[#allocation1 + $0x30] sm:$0xff pattern:$0x73625140]  ;;  %v57_v24 = vsel %vm47_vm1, %v36_v19, 0.0 }
  0x13   :  { %v52_v20 = vadd.f32 %v51_v15, %v50_v17  ;;  %v38_v25 = vld.sshfl [vmem:[#allocation1 + $0x38] sm:$0xff pattern:$0x73625140]  ;;  %v59_v27 = vsel %vm47_vm1, %v37_v22, 0.0 }
  0x14   :  { %v61_v29 = vsel %vm47_vm1, %v38_v25, 0.0 }
  0x15   :  { %v54_v23 = vadd.f32 %v53_v18, %v52_v20 }
  0x17   :  { %v56_v26 = vadd.f32 %v55_v21, %v54_v23 }
  0x19   :  { %v58_v28 = vadd.f32 %v57_v24, %v56_v26 }
  0x1b   :  { %v60_v30 = vadd.f32 %v59_v27, %v58_v28 }
  0x1d   :  { %v62_v31 = vadd.f32 %v61_v29, %v60_v30 }
  0x1f   :  { %63 = vadd.xlane.f32.xlu0 %v62_v31 }
  0x92   :  { %v64_v34 = vpop.xlane.xlu0 %63 }
  0x93   :  { %v65_v35 = vadd.f32 %v64_v34, %v25_v33 }
  0x95   :  { %67 = vst.msk [vmem:[#allocation2] sm:$0x3] %vm15_vm0, %v65_v35 }
  0x9c   :  { %v71_v36 = vld [vmem:[#allocation2] sm:$0x3] }
  0x9d   :  { %v72_v37 = vmul.f32 0.0009765625, %v71_v36 }
  0x9f   :  { %75 = vperm.xlu0 %85, %v72_v37  }
 0x111   :  { %v76_v38 = vpop.permute.xlu0 %75 }
 0x112   :  { %78 = vst [vmem:[%s130_s2] sm:$0x3] %v76_v38 }

</bundles_post_ra>
